<compile_context>
chip_gen: v7x
topology: tpu7x:2x2x1
jax: 0.10.0
libtpu: 0.0.40
codegen_flags: <defaults>
</compile_context>

<pallas_src>
import functools

import jax
import jax.numpy as jnp
from jax.experimental import pallas as pl
from jax.experimental.pallas import tpu as pltpu


def _round_up(v, m):
    return (v + m - 1) // m * m


def _cdiv(a, b):
    return -(-a // b)


def _flow_kernel(x_ref, p_ref, o_ref, *, layer_dims, row_offs):
    """Fused monotonic sigmoid flow over one batch tile.

    x_ref : (n_in, TN) feature-major batch tile.
    p_ref : (R, C) packed parameter slab. For layer l (8-row-aligned offset
            row_offs[l]) rows hold [A'_l | b'_l]; the last block (row_offs[-1])
            holds the pre-scaled final mixing matrix Wf = 0.5*softmax(W_last).
    o_ref : (out_last, TN) output tile.

    Per layer the kernel computes  t = tanh(A' @ t_prev + b')  via tiny
    broadcast-FMAs (VPU) + one tanh (EUP); all softmax/exp/W/sigmoid-affine
    folding was done once in the wrapper.
    """
    h = x_ref[...].astype(jnp.float32)                     # (in_dim, TN)
    tn = h.shape[-1]

    for l, (in_d, out_d) in enumerate(layer_dims):
        r0 = row_offs[l]
        a = p_ref[r0:r0 + out_d, 0:in_d]                   # (out_d, in_d)
        bias = p_ref[r0:r0 + out_d, in_d:in_d + 1]         # (out_d, 1)
        # c = A' @ h + b'  — tiny-K matmul as VPU broadcast-FMAs, bias folded
        # into the accumulator init (no MXU padding / drain).
        c = jnp.broadcast_to(bias, (out_d, tn))
        for k in range(in_d):
            c = c + a[:, k:k + 1] * h[k:k + 1, :]
        h = jnp.tanh(c)                                    # EUP slot

    # Final mix: out = Wf @ t + 0.5  (Wf = 0.5*softmax(W_last); rows of the
    # softmax sum to 1, so the sigmoid's +0.5 collapses into a constant bias).
    out_d = layer_dims[-1][1]
    rf = row_offs[-1]
    wf = p_ref[rf:rf + out_d, 0:out_d]                     # (out_d, out_d)
    acc = jnp.full((out_d, tn), 0.5, dtype=jnp.float32)
    for d in range(out_d):
        acc = acc + wf[:, d:d + 1] * h[d:d + 1, :]
    o_ref[...] = acc.astype(o_ref.dtype)


def sigmoid_flow_nd_monotonic(layer_params, x, extra=None, *, block_n=65536):
    """JAX/Pallas port of SigmoidFlowNDMonotonic.forward.

    layer_params: list of (unnormalized_w, log_a, b, unnormalized_u) per layer.
    x           : any shape; flattened to (B,) like torch's x.reshape(-1,1,1).
    extra       : optional flat array of length (n_in - 1) * B.
    Returns (B, 1, 1), matching the PyTorch module.
    """
    n_in = layer_params[0][3].shape[1]
    xf = jnp.asarray(x, jnp.float32).reshape(-1)
    bsz = xf.shape[0]

    # ---- Batch tiling: lane-dense, adaptive tile size --------------------
    # Per-grid-step overhead is ~0.35us, so use big tiles; keep pad waste
    # small and keep >=2-4 steps at large B so megacore can split the grid.
    b128 = _round_up(max(bsz, 1), 128)
    if b128 >= 4 * 16384:
        min_steps = 4
    elif b128 >= 2 * 8192:
        min_steps = 2
    else:
        min_steps = 1
    steps = max(_cdiv(b128, block_n), min_steps)
    tn = _round_up(_cdiv(b128, steps), 128)
    b_pad = tn * steps

    # ---- Feature matrix: single materialization at padded width ----------
    pad1 = (0, b_pad - bsz)
    if extra is not None:
        chunks = jnp.split(jnp.asarray(extra, jnp.float32).reshape(-1), n_in - 1)
        pieces = [jnp.pad(xf, pad1)] + [jnp.pad(c, pad1) for c in chunks]
        feat = jnp.stack(pieces, axis=0)                   # (n_in, b_pad)
    else:
        assert n_in == 1, "without `extra` the first layer needs in_dim == 1"
        feat = jnp.pad(xf, pad1).reshape(1, b_pad)

    # ---- Parameter folding (once per call, O(n_dim^3), batch-independent) -
    # AU_l = exp(log_a_l)*softmax(u_l); W_l = softmax(w_l).
    # Fold W_l into layer l+1:  M_{l+1} = AU_{l+1} @ W_l.
    # Fold sigmoid = 0.5*tanh(0.5*x)+0.5 into the weights so the kernel only
    # needs tanh:  c_l = A'_l @ t_{l-1} + b'_l,  t_l = tanh(c_l).
    aus, bs, ws = [], [], []
    for (uw, log_a, b, uu) in layer_params:
        aus.append(jnp.exp(jnp.asarray(log_a, jnp.float32))
                   * jax.nn.softmax(jnp.asarray(uu, jnp.float32), axis=1))
        bs.append(jnp.asarray(b, jnp.float32))
        ws.append(jax.nn.softmax(jnp.asarray(uw, jnp.float32), axis=1))

    num_layers = len(layer_params)
    folded = []
    layer_dims = []
    for l in range(num_layers):
        if l == 0:
            a_eff = 0.5 * aus[0]
            b_eff = 0.5 * bs[0]
        else:
            m = aus[l] @ ws[l - 1]
            a_eff = 0.25 * m
            b_eff = 0.25 * jnp.sum(m, axis=1, keepdims=True) + 0.5 * bs[l]
        folded.append((a_eff, b_eff))
        layer_dims.append((int(a_eff.shape[1]), int(a_eff.shape[0])))
    assert layer_dims[0][0] == n_in
    out_last = int(ws[-1].shape[0])
    wf = 0.5 * ws[-1]                                      # (out_last, out_last)

    # ---- Pack all params into one sublane-aligned slab --------------------
    widths = [in_d + 1 for (in_d, _) in layer_dims] + [out_last]
    slab_c = max(widths)
    row_offs = []
    r = 0
    for (_, out_d) in layer_dims:
        row_offs.append(r)
        r += _round_up(out_d, 8)
    row_offs.append(r)                                     # final-W block
    slab_r = r + _round_up(out_last, 8)

    slab = jnp.zeros((slab_r, slab_c), jnp.float32)
    for (a_eff, b_eff), r0 in zip(folded, row_offs[:-1]):
        out_d, in_d = a_eff.shape
        slab = slab.at[r0:r0 + out_d, 0:in_d].set(a_eff)
        slab = slab.at[r0:r0 + out_d, in_d:in_d + 1].set(b_eff)
    slab = slab.at[row_offs[-1]:row_offs[-1] + out_last, 0:out_last].set(wf)

    # ---- Pallas call -------------------------------------------------------
    kernel = functools.partial(
        _flow_kernel, layer_dims=tuple(layer_dims), row_offs=tuple(row_offs))

    out = pl.pallas_call(
        kernel,
        out_shape=jax.ShapeDtypeStruct((out_last, b_pad), jnp.float32),
        grid=(steps,),
        in_specs=[
            pl.BlockSpec((n_in, tn), lambda i: (0, i)),
            pl.BlockSpec((slab_r, slab_c), lambda i: (0, 0)),  # resident params
        ],
        out_specs=pl.BlockSpec((out_last, tn), lambda i: (0, i)),
        compiler_params=pltpu.CompilerParams(
            dimension_semantics=("parallel",),
            # Big batch tiles need more than the default scoped-VMEM limit
            # (16 MiB on v5e, 32 MiB on v6e/v7x); 48 MiB is safe on all of
            # v5e/v6e (128 MiB physical) and v7x (64 MiB/TC physical).
            vmem_limit_bytes=48 * 1024 * 1024,
        ),
    )(feat, slab)

    return out[:, :bsz].T.reshape(bsz, out_last, 1)


def sigmoid_flow_nd_monotonic_ref(layer_params, x, extra=None):
    """Pure-JAX reference mirroring the PyTorch forward."""
    n_in = layer_params[0][3].shape[1]
    xf = jnp.asarray(x, jnp.float32).reshape(-1)
    bsz = xf.shape[0]
    if extra is not None:
        chunks = jnp.split(jnp.asarray(extra, jnp.float32).reshape(-1), n_in - 1)
        h = jnp.stack([xf] + list(chunks), axis=0)             # (n_in, B)
    else:
        h = xf.reshape(1, bsz)
    for (uw, log_a, b, uu) in layer_params:
        a = jnp.exp(log_a)
        u = jax.nn.softmax(uu, axis=1)
        w = jax.nn.softmax(uw, axis=1)
        inner = (a * u) @ h + b
        s = jax.nn.sigmoid(inner)
        h = w @ s
    return h.reshape(bsz, 1, 1)
    # TODO(synk): the module's in-forward NaN checks + pdb.set_trace() hooks
    # have no kernel equivalent and are omitted.


if __name__ == "__main__":
    n_in, num_layers, n_dim = 3, 2, 8
    batch = 64

    key = jax.random.PRNGKey(0)
    dims = [(n_in, n_dim)] + [(n_dim, n_dim)] * (num_layers - 1) + [(n_dim, 1)]
    layer_params = []
    for (in_dim, out_dim) in dims:
        key, k1, k2, k3, k4 = jax.random.split(key, 5)
        layer_params.append((
            jax.random.normal(k1, (out_dim, out_dim), jnp.float32),  # unnormalized_w
            jax.random.normal(k2, (out_dim, 1), jnp.float32),        # log_a
            jax.random.normal(k3, (out_dim, 1), jnp.float32),        # b
            jax.random.normal(k4, (out_dim, in_dim), jnp.float32),   # unnormalized_u
        ))

    key, kx, ke = jax.random.split(key, 3)
    x = jax.random.normal(kx, (batch,), jnp.float32)
    extra = jax.random.normal(ke, ((n_in - 1) * batch,), jnp.float32)

    y = sigmoid_flow_nd_monotonic(layer_params, x, extra)
    y = jax.block_until_ready(y)

    y_ref = sigmoid_flow_nd_monotonic_ref(layer_params, x, extra)
    assert y.shape == (batch, 1, 1)
    assert jnp.allclose(y, y_ref, atol=1e-5, rtol=1e-5), "mismatch vs reference"

    print("KERNEL_OK")
</pallas_src>

<mosaic_0001>
module attributes {stable_mosaic.version = 11 : i64} {
  func.func @_flow_kernel(%arg0: i32, %arg1: memref<3x128xf32, #tpu.memory_space<vmem>>, %arg2: memref<32x9xf32, #tpu.memory_space<vmem>>, %arg3: memref<1x128xf32, #tpu.memory_space<vmem>>) attributes {dimension_semantics = [#tpu.dimension_semantics<parallel>], iteration_bounds = array<i64: 1>, scalar_prefetch = 0 : i64, scratch_operands = 0 : i64, tpu.core_type = #tpu.core_type<tc>, window_params = [{transform_indices = @transform_0, window_bounds = array<i64: 3, 128>}, {pipeline_mode = #tpu.pipeline_mode<synchronous>, transform_indices = @transform_1, window_bounds = array<i64: 32, 9>}, {transform_indices = @transform_2, window_bounds = array<i64: 1, 128>}]} {
    %c0 = arith.constant 0 : index
    %c0_0 = arith.constant 0 : index
    %0 = vector.load %arg1[%c0, %c0_0] : memref<3x128xf32, #tpu.memory_space<vmem>>, vector<3x128xf32>
    %c0_1 = arith.constant 0 : index
    %c0_2 = arith.constant 0 : index
    %1 = vector.load %arg2[%c0_1, %c0_2] : memref<32x9xf32, #tpu.memory_space<vmem>>, vector<8x3xf32>
    %c0_3 = arith.constant 0 : index
    %c3 = arith.constant 3 : index
    %2 = vector.load %arg2[%c0_3, %c3] : memref<32x9xf32, #tpu.memory_space<vmem>>, vector<8x1xf32>
    %3 = vector.shape_cast %2 : vector<8x1xf32> to vector<8x1xf32>
    %4 = vector.broadcast %3 : vector<8x1xf32> to vector<8x128xf32>
    %5 = vector.extract_strided_slice %1 {offsets = [0, 0], sizes = [8, 1], strides = [1, 1]} : vector<8x3xf32> to vector<8x1xf32>
    %6 = vector.extract_strided_slice %0 {offsets = [0, 0], sizes = [1, 128], strides = [1, 1]} : vector<3x128xf32> to vector<1x128xf32>
    %7 = vector.broadcast %5 : vector<8x1xf32> to vector<8x128xf32>
    %8 = vector.broadcast %6 : vector<1x128xf32> to vector<8x128xf32>
    %9 = arith.mulf %7, %8 : vector<8x128xf32>
    %10 = arith.addf %4, %9 : vector<8x128xf32>
    %11 = vector.extract_strided_slice %1 {offsets = [0, 1], sizes = [8, 1], strides = [1, 1]} : vector<8x3xf32> to vector<8x1xf32>
    %12 = vector.extract_strided_slice %0 {offsets = [1, 0], sizes = [1, 128], strides = [1, 1]} : vector<3x128xf32> to vector<1x128xf32>
    %13 = vector.broadcast %11 : vector<8x1xf32> to vector<8x128xf32>
    %14 = vector.broadcast %12 : vector<1x128xf32> to vector<8x128xf32>
    %15 = arith.mulf %13, %14 : vector<8x128xf32>
    %16 = arith.addf %10, %15 : vector<8x128xf32>
    %17 = vector.extract_strided_slice %1 {offsets = [0, 2], sizes = [8, 1], strides = [1, 1]} : vector<8x3xf32> to vector<8x1xf32>
    %18 = vector.extract_strided_slice %0 {offsets = [2, 0], sizes = [1, 128], strides = [1, 1]} : vector<3x128xf32> to vector<1x128xf32>
    %19 = vector.broadcast %17 : vector<8x1xf32> to vector<8x128xf32>
    %20 = vector.broadcast %18 : vector<1x128xf32> to vector<8x128xf32>
    %21 = arith.mulf %19, %20 : vector<8x128xf32>
    %22 = arith.addf %16, %21 : vector<8x128xf32>
    %23 = math.tanh %22 : vector<8x128xf32>
    %c8 = arith.constant 8 : index
    %c0_4 = arith.constant 0 : index
    %24 = vector.load %arg2[%c8, %c0_4] : memref<32x9xf32, #tpu.memory_space<vmem>>, vector<8x8xf32>
    %c8_5 = arith.constant 8 : index
    %c8_6 = arith.constant 8 : index
    %25 = vector.load %arg2[%c8_5, %c8_6] : memref<32x9xf32, #tpu.memory_space<vmem>>, vector<8x1xf32>
    %26 = vector.shape_cast %25 : vector<8x1xf32> to vector<8x1xf32>
    %27 = vector.broadcast %26 : vector<8x1xf32> to vector<8x128xf32>
    %28 = vector.extract_strided_slice %24 {offsets = [0, 0], sizes = [8, 1], strides = [1, 1]} : vector<8x8xf32> to vector<8x1xf32>
    %29 = vector.extract_strided_slice %23 {offsets = [0, 0], sizes = [1, 128], strides = [1, 1]} : vector<8x128xf32> to vector<1x128xf32>
    %30 = vector.broadcast %28 : vector<8x1xf32> to vector<8x128xf32>
    %31 = vector.broadcast %29 : vector<1x128xf32> to vector<8x128xf32>
    %32 = arith.mulf %30, %31 : vector<8x128xf32>
    %33 = arith.addf %27, %32 : vector<8x128xf32>
    %34 = vector.extract_strided_slice %24 {offsets = [0, 1], sizes = [8, 1], strides = [1, 1]} : vector<8x8xf32> to vector<8x1xf32>
    %35 = vector.extract_strided_slice %23 {offsets = [1, 0], sizes = [1, 128], strides = [1, 1]} : vector<8x128xf32> to vector<1x128xf32>
    %36 = vector.broadcast %34 : vector<8x1xf32> to vector<8x128xf32>
    %37 = vector.broadcast %35 : vector<1x128xf32> to vector<8x128xf32>
    %38 = arith.mulf %36, %37 : vector<8x128xf32>
    %39 = arith.addf %33, %38 : vector<8x128xf32>
    %40 = vector.extract_strided_slice %24 {offsets = [0, 2], sizes = [8, 1], strides = [1, 1]} : vector<8x8xf32> to vector<8x1xf32>
    %41 = vector.extract_strided_slice %23 {offsets = [2, 0], sizes = [1, 128], strides = [1, 1]} : vector<8x128xf32> to vector<1x128xf32>
    %42 = vector.broadcast %40 : vector<8x1xf32> to vector<8x128xf32>
    %43 = vector.broadcast %41 : vector<1x128xf32> to vector<8x128xf32>
    %44 = arith.mulf %42, %43 : vector<8x128xf32>
    %45 = arith.addf %39, %44 : vector<8x128xf32>
    %46 = vector.extract_strided_slice %24 {offsets = [0, 3], sizes = [8, 1], strides = [1, 1]} : vector<8x8xf32> to vector<8x1xf32>
    %47 = vector.extract_strided_slice %23 {offsets = [3, 0], sizes = [1, 128], strides = [1, 1]} : vector<8x128xf32> to vector<1x128xf32>
    %48 = vector.broadcast %46 : vector<8x1xf32> to vector<8x128xf32>
    %49 = vector.broadcast %47 : vector<1x128xf32> to vector<8x128xf32>
    %50 = arith.mulf %48, %49 : vector<8x128xf32>
    %51 = arith.addf %45, %50 : vector<8x128xf32>
    %52 = vector.extract_strided_slice %24 {offsets = [0, 4], sizes = [8, 1], strides = [1, 1]} : vector<8x8xf32> to vector<8x1xf32>
    %53 = vector.extract_strided_slice %23 {offsets = [4, 0], sizes = [1, 128], strides = [1, 1]} : vector<8x128xf32> to vector<1x128xf32>
    %54 = vector.broadcast %52 : vector<8x1xf32> to vector<8x128xf32>
    %55 = vector.broadcast %53 : vector<1x128xf32> to vector<8x128xf32>
    %56 = arith.mulf %54, %55 : vector<8x128xf32>
    %57 = arith.addf %51, %56 : vector<8x128xf32>
    %58 = vector.extract_strided_slice %24 {offsets = [0, 5], sizes = [8, 1], strides = [1, 1]} : vector<8x8xf32> to vector<8x1xf32>
    %59 = vector.extract_strided_slice %23 {offsets = [5, 0], sizes = [1, 128], strides = [1, 1]} : vector<8x128xf32> to vector<1x128xf32>
    %60 = vector.broadcast %58 : vector<8x1xf32> to vector<8x128xf32>
    %61 = vector.broadcast %59 : vector<1x128xf32> to vector<8x128xf32>
    %62 = arith.mulf %60, %61 : vector<8x128xf32>
    %63 = arith.addf %57, %62 : vector<8x128xf32>
    %64 = vector.extract_strided_slice %24 {offsets = [0, 6], sizes = [8, 1], strides = [1, 1]} : vector<8x8xf32> to vector<8x1xf32>
    %65 = vector.extract_strided_slice %23 {offsets = [6, 0], sizes = [1, 128], strides = [1, 1]} : vector<8x128xf32> to vector<1x128xf32>
    %66 = vector.broadcast %64 : vector<8x1xf32> to vector<8x128xf32>
    %67 = vector.broadcast %65 : vector<1x128xf32> to vector<8x128xf32>
    %68 = arith.mulf %66, %67 : vector<8x128xf32>
    %69 = arith.addf %63, %68 : vector<8x128xf32>
    %70 = vector.extract_strided_slice %24 {offsets = [0, 7], sizes = [8, 1], strides = [1, 1]} : vector<8x8xf32> to vector<8x1xf32>
    %71 = vector.extract_strided_slice %23 {offsets = [7, 0], sizes = [1, 128], strides = [1, 1]} : vector<8x128xf32> to vector<1x128xf32>
    %72 = vector.broadcast %70 : vector<8x1xf32> to vector<8x128xf32>
    %73 = vector.broadcast %71 : vector<1x128xf32> to vector<8x128xf32>
    %74 = arith.mulf %72, %73 : vector<8x128xf32>
    %75 = arith.addf %69, %74 : vector<8x128xf32>
    %76 = math.tanh %75 : vector<8x128xf32>
    %c16 = arith.constant 16 : index
    %c0_7 = arith.constant 0 : index
    %77 = vector.load %arg2[%c16, %c0_7] : memref<32x9xf32, #tpu.memory_space<vmem>>, vector<1x8xf32>
    %c16_8 = arith.constant 16 : index
    %c8_9 = arith.constant 8 : index
    %78 = vector.load %arg2[%c16_8, %c8_9] : memref<32x9xf32, #tpu.memory_space<vmem>>, vector<1x1xf32>
    %79 = vector.shape_cast %78 : vector<1x1xf32> to vector<1x1xf32>
    %80 = vector.broadcast %79 : vector<1x1xf32> to vector<1x128xf32>
    %81 = vector.extract_strided_slice %77 {offsets = [0, 0], sizes = [1, 1], strides = [1, 1]} : vector<1x8xf32> to vector<1x1xf32>
    %82 = vector.extract_strided_slice %76 {offsets = [0, 0], sizes = [1, 128], strides = [1, 1]} : vector<8x128xf32> to vector<1x128xf32>
    %83 = vector.broadcast %81 : vector<1x1xf32> to vector<1x128xf32>
    %84 = arith.mulf %83, %82 : vector<1x128xf32>
    %85 = arith.addf %80, %84 : vector<1x128xf32>
    %86 = vector.extract_strided_slice %77 {offsets = [0, 1], sizes = [1, 1], strides = [1, 1]} : vector<1x8xf32> to vector<1x1xf32>
    %87 = vector.extract_strided_slice %76 {offsets = [1, 0], sizes = [1, 128], strides = [1, 1]} : vector<8x128xf32> to vector<1x128xf32>
    %88 = vector.broadcast %86 : vector<1x1xf32> to vector<1x128xf32>
    %89 = arith.mulf %88, %87 : vector<1x128xf32>
    %90 = arith.addf %85, %89 : vector<1x128xf32>
    %91 = vector.extract_strided_slice %77 {offsets = [0, 2], sizes = [1, 1], strides = [1, 1]} : vector<1x8xf32> to vector<1x1xf32>
    %92 = vector.extract_strided_slice %76 {offsets = [2, 0], sizes = [1, 128], strides = [1, 1]} : vector<8x128xf32> to vector<1x128xf32>
    %93 = vector.broadcast %91 : vector<1x1xf32> to vector<1x128xf32>
    %94 = arith.mulf %93, %92 : vector<1x128xf32>
    %95 = arith.addf %90, %94 : vector<1x128xf32>
    %96 = vector.extract_strided_slice %77 {offsets = [0, 3], sizes = [1, 1], strides = [1, 1]} : vector<1x8xf32> to vector<1x1xf32>
    %97 = vector.extract_strided_slice %76 {offsets = [3, 0], sizes = [1, 128], strides = [1, 1]} : vector<8x128xf32> to vector<1x128xf32>
    %98 = vector.broadcast %96 : vector<1x1xf32> to vector<1x128xf32>
    %99 = arith.mulf %98, %97 : vector<1x128xf32>
    %100 = arith.addf %95, %99 : vector<1x128xf32>
    %101 = vector.extract_strided_slice %77 {offsets = [0, 4], sizes = [1, 1], strides = [1, 1]} : vector<1x8xf32> to vector<1x1xf32>
    %102 = vector.extract_strided_slice %76 {offsets = [4, 0], sizes = [1, 128], strides = [1, 1]} : vector<8x128xf32> to vector<1x128xf32>
    %103 = vector.broadcast %101 : vector<1x1xf32> to vector<1x128xf32>
    %104 = arith.mulf %103, %102 : vector<1x128xf32>
    %105 = arith.addf %100, %104 : vector<1x128xf32>
    %106 = vector.extract_strided_slice %77 {offsets = [0, 5], sizes = [1, 1], strides = [1, 1]} : vector<1x8xf32> to vector<1x1xf32>
    %107 = vector.extract_strided_slice %76 {offsets = [5, 0], sizes = [1, 128], strides = [1, 1]} : vector<8x128xf32> to vector<1x128xf32>
    %108 = vector.broadcast %106 : vector<1x1xf32> to vector<1x128xf32>
    %109 = arith.mulf %108, %107 : vector<1x128xf32>
    %110 = arith.addf %105, %109 : vector<1x128xf32>
    %111 = vector.extract_strided_slice %77 {offsets = [0, 6], sizes = [1, 1], strides = [1, 1]} : vector<1x8xf32> to vector<1x1xf32>
    %112 = vector.extract_strided_slice %76 {offsets = [6, 0], sizes = [1, 128], strides = [1, 1]} : vector<8x128xf32> to vector<1x128xf32>
    %113 = vector.broadcast %111 : vector<1x1xf32> to vector<1x128xf32>
    %114 = arith.mulf %113, %112 : vector<1x128xf32>
    %115 = arith.addf %110, %114 : vector<1x128xf32>
    %116 = vector.extract_strided_slice %77 {offsets = [0, 7], sizes = [1, 1], strides = [1, 1]} : vector<1x8xf32> to vector<1x1xf32>
    %117 = vector.extract_strided_slice %76 {offsets = [7, 0], sizes = [1, 128], strides = [1, 1]} : vector<8x128xf32> to vector<1x128xf32>
    %118 = vector.broadcast %116 : vector<1x1xf32> to vector<1x128xf32>
    %119 = arith.mulf %118, %117 : vector<1x128xf32>
    %120 = arith.addf %115, %119 : vector<1x128xf32>
    %121 = math.tanh %120 : vector<1x128xf32>
    %c24 = arith.constant 24 : index
    %c0_10 = arith.constant 0 : index
    %122 = vector.load %arg2[%c24, %c0_10] : memref<32x9xf32, #tpu.memory_space<vmem>>, vector<1x1xf32>
    %cst = arith.constant 5.000000e-01 : f32
    %123 = vector.broadcast %cst : f32 to vector<1x128xf32>
    %124 = vector.broadcast %122 : vector<1x1xf32> to vector<1x128xf32>
    %125 = arith.mulf %124, %121 : vector<1x128xf32>
    %126 = arith.addf %123, %125 : vector<1x128xf32>
    %c0_11 = arith.constant 0 : index
    %c0_12 = arith.constant 0 : index
    %127 = vector.load %arg3[%c0_11, %c0_12] : memref<1x128xf32, #tpu.memory_space<vmem>>, vector<1x128xf32>
    tpu.vector_store %arg3[%c0_11, %c0_12], %126 {strides = array<i32>} : memref<1x128xf32, #tpu.memory_space<vmem>>, vector<1x128xf32>,
    return
  }
  func.func @transform_0(%arg0: i32) -> (i32, i32) {
    %c0_i32 = arith.constant 0 : i32
    %c0_i32_0 = arith.constant 0 : i32
    return %c0_i32, %arg0 : i32, i32
  }
  func.func @transform_1(%arg0: i32) -> (i32, i32) {
    %c0_i32 = arith.constant 0 : i32
    %c0_i32_0 = arith.constant 0 : i32
    %c0_i32_1 = arith.constant 0 : i32
    return %c0_i32, %c0_i32_0 : i32, i32
  }
  func.func @transform_2(%arg0: i32) -> (i32, i32) {
    %c0_i32 = arith.constant 0 : i32
    %c0_i32_0 = arith.constant 0 : i32
    return %c0_i32, %arg0 : i32, i32
  }
}

</mosaic_0001>

<bundles_post_ra>
// kernel: tpu_custom_call.1
= control target key start
LH: loop header
LB: loop body
LE: loop exit
PB: predicated region body
PF: predicated region fallthrough
CT: control target
= control target key end

     0   :  { %v294_v1 = vmov 1   ;;  %v295_v2 = vmov 0   ;;  %s346_s0 = inlined_call_operand.vmem [shape: f32[3,128], index: 0, kind: input, shape index: {}]   ;;  %s347_s1 = inlined_call_operand.vmem [shape: f32[32,9], index: 1, kind: input, shape index: {}]   ;;  %s348_s2 = inlined_call_operand.hbm [shape: f32[1,128], index: 2, kind: output, shape index: {}]  }
   0x1   :  { %v13_v0 = vld [vmem:[%s347_s1] sm:$0xff]  ;;  %242 = vset.pattern.permute.xlu1 %v294_v1  ;;  %240 = vset.pattern.permute.xlu0 %v295_v2 }
   0x2   :  { %30 = vperm.xlu1 %242, %v13_v0   ;;  %20 = vperm.xlu0 %240, %v13_v0  }
   0x3   :  { %7 = vsyncpa [#allocation3], 0  ;;  %v296_v3 = vmov 2   ;;  %v297_v4 = vmov 3   ;;  %v50_v5 = vld [vmem:[%s347_s1 + $0x8] sm:$0xff]  ;;  %v298_v6 = vmov 8   ;;  %v23_v13 = vlaneseq }
   0x4   :  { %v299_v7 = vmov 6   ;;  %v300_v8 = vmov 4   ;;  %v137_v9 = vld [vmem:[%s347_s1 + $0x10] sm:$0x1]  ;;  %v301_v10 = vmov 5   ;;  %v302_v11 = vmov 7  }
   0x5   :  { %v207_v12 = vld [vmem:[%s347_s1 + $0x18] sm:$0x1]  ;;  %v24_v14 = vshrl.u32 %v23_v13, 7  ;;  %v12_v16 = vld [vmem:[%s346_s0] sm:$0x7]  ;;  %s303_s0 = smov [#allocation2]  }
   0x6   :  { %243 = vset.pattern.permute.xlu1 %v296_v3  ;;  %241 = vset.pattern.permute.xlu0 %v297_v4  ;;  %s222_s1 = sshll.u32 %s303_s0, 4  ;;  %s223_s1 = int_to_ptr.vmem [resolvable:$true] %s222_s1 }
   0x7   :  { %40 = vperm.xlu1 %243, %v13_v0   ;;  %16 = vperm.xlu0 %241, %v13_v0   ;;  %v25_v15 = vsub.s32 0, %v24_v14  ;;  %v35_v17 = vsub.s32 1, %v24_v14  ;;  %v45_v18 = vsub.s32 2, %v24_v14  ;;  %v92_v39 = vsub.s32 3, %v24_v14  ;;  %s270_s19 = scalar_lea.vmem %s223_s1, 16  ;;  %s274_s20 = scalar_lea.vmem %s223_s1, 32 }
   0x8   :  { %v102_v42 = vsub.s32 4, %v24_v14  ;;  %v122_v48 = vsub.s32 6, %v24_v14  ;;  %v112_v52 = vsub.s32 5, %v24_v14  ;;  %v132_v56 = vsub.s32 7, %v24_v14  ;;  %p271_p0 = scmp.ne.s32.totalorder %s223_s1, %s270_s19  ;;  %p275_p1 = scmp.lt.s32.totalorder %s223_s1, %s223_s1 }
   0x9   :  { %v26_v20 = vrot.slane %v12_v16, %v25_v15  ;;  %v36_v22 = vrot.slane %v12_v16, %v35_v17  ;;  %v46_v23 = vrot.slane %v12_v16, %v45_v18  ;;  %p276_p2 = scmp.lt.s32.totalorder %s274_s20, %s270_s19 }
   0xb   :  { %244 = vset.pattern.permute.xlu1 %v295_v2  ;;  %245 = vset.pattern.permute.xlu0 %v298_v6  ;;  %p277_p3 = por %p276_p2, %p275_p1 }
   0xc   :  { %57 = vperm.xlu1 %244, %v50_v5   ;;  %53 = vperm.xlu0 %245, %v50_v5  }
   0xd   :  { %p278_p4 = pnand %p277_p3, %p271_p0 }
  0x10   :  { %246 = vset.pattern.permute.xlu1 %v294_v1  ;;  %248 = vset.pattern.permute.xlu0 %v297_v4 }
  0x11   :  { %67 = vperm.xlu1 %246, %v50_v5   ;;  %87 = vperm.xlu0 %248, %v50_v5  }
  0x15   :  { %247 = vset.pattern.permute.xlu1 %v296_v3  ;;  %251 = vset.pattern.permute.xlu0 %v299_v7 }
  0x16   :  { %77 = vperm.xlu1 %247, %v50_v5   ;;  %117 = vperm.xlu0 %251, %v50_v5  }
  0x1a   :  { %249 = vset.pattern.permute.xlu1 %v300_v8  ;;  %254 = vset.pattern.permute.xlu0 %v298_v6 }
  0x1b   :  { %97 = vperm.xlu1 %249, %v50_v5   ;;  %140 = vperm.xlu0 %254, %v137_v9  }
  0x1f   :  { %250 = vset.pattern.permute.xlu1 %v301_v10  ;;  %257 = vset.pattern.permute.xlu0 %v297_v4 }
  0x20   :  { %107 = vperm.xlu1 %250, %v50_v5   ;;  %167 = vperm.xlu0 %257, %v137_v9  }
  0x24   :  { %252 = vset.pattern.permute.xlu1 %v302_v11  ;;  %260 = vset.pattern.permute.xlu0 %v299_v7 }
  0x25   :  { %127 = vperm.xlu1 %252, %v50_v5   ;;  %191 = vperm.xlu0 %260, %v137_v9  }
  0x29   :  { %253 = vset.pattern.permute.xlu1 %v295_v2  ;;  %263 = vset.pattern.permute.xlu0 %v295_v2 }
  0x2a   :  { %144 = vperm.xlu1 %253, %v137_v9  }
  0x2e   :  { %255 = vset.pattern.permute.xlu1 %v294_v1 }
  0x2f   :  { %150 = vperm.xlu1 %255, %v137_v9  }
  0x33   :  { %256 = vset.pattern.permute.xlu1 %v296_v3 }
  0x34   :  { %159 = vperm.xlu1 %256, %v137_v9  }
  0x38   :  { %258 = vset.pattern.permute.xlu1 %v300_v8 }
  0x39   :  { %175 = vperm.xlu1 %258, %v137_v9  }
  0x3d   :  { %259 = vset.pattern.permute.xlu1 %v301_v10 }
  0x3e   :  { %183 = vperm.xlu1 %259, %v137_v9  }
  0x42   :  { %261 = vset.pattern.permute.xlu1 %v302_v11 }
  0x43   :  { %199 = vperm.xlu1 %261, %v137_v9  }
  0x47   :  { %262 = vset.pattern.permute.xlu1 %v295_v2 }
  0x48   :  { %210 = vperm.xlu1 %262, %v207_v12  }
  0x81   :  { %v21_v19 = vpop.permute.xlu0 %20  ;;  %v31_v21 = vpop.permute.xlu1 %30 }
  0x82   :  { %v27_v24 = vmul.f32 %v26_v20, %v21_v19  ;;  %v37_v27 = vmul.f32 %v36_v22, %v31_v21 }
  0x86   :  { %v17_v25 = vpop.permute.xlu0 %16  ;;  %v41_v26 = vpop.permute.xlu1 %40 }
  0x87   :  { %v28_v28 = vadd.f32 %v27_v24, %v17_v25  ;;  %v47_v29 = vmul.f32 %v46_v23, %v41_v26 }
  0x89   :  { %v38_v30 = vadd.f32 %v37_v27, %v28_v28 }
  0x8b   :  { %v48_v31 = vadd.f32 %v47_v29, %v38_v30  ;;  %v58_v32 = vpop.permute.xlu1 %57  ;;  %v54_v36 = vpop.permute.xlu0 %53 }
  0x8d   :  { %264 = vtanh.f32 %v48_v31 }
  0x90   :  { %v68_v33 = vpop.permute.xlu1 %67  ;;  %v88_v47 = vpop.permute.xlu0 %87 }
  0x95   :  { %v78_v34 = vpop.permute.xlu1 %77  ;;  %v118_v61 = vpop.permute.xlu0 %117 }
  0x97   :  { %v265_v35 = vpop.eup %264 }
  0x98   :  { %v63_v37 = vrot.slane %v265_v35, %v25_v15  ;;  %v73_v38 = vrot.slane %v265_v35, %v35_v17  ;;  %v83_v41 = vrot.slane %v265_v35, %v45_v18  ;;  %v93_v46 = vrot.slane %v265_v35, %v92_v39 }
  0x99   :  { %v103_v51 = vrot.slane %v265_v35, %v102_v42  ;;  %v123_v57 = vrot.slane %v265_v35, %v122_v48  ;;  %v113_v60 = vrot.slane %v265_v35, %v112_v52  ;;  %v133_v3 = vrot.slane %v265_v35, %v132_v56 }
  0x9a   :  { %v64_v40 = vmul.f32 %v63_v37, %v58_v32  ;;  %v98_v43 = vpop.permute.xlu1 %97  ;;  %v74_v45 = vmul.f32 %v73_v38, %v68_v33  ;;  %v84_v50 = vmul.f32 %v83_v41, %v78_v34  ;;  %v94_v54 = vmul.f32 %v93_v46, %v88_v47  ;;  %v141_v10 = vpop.permute.xlu0 %140 }
  0x9b   :  { %v104_v59 = vmul.f32 %v103_v51, %v98_v43  ;;  %v124_v1 = vmul.f32 %v123_v57, %v118_v61 }
  0x9c   :  { %v65_v44 = vadd.f32 %v64_v40, %v54_v36 }
  0x9e   :  { %v75_v49 = vadd.f32 %v74_v45, %v65_v44 }
  0x9f   :  { %v108_v53 = vpop.permute.xlu1 %107  ;;  %v168_v19 = vpop.permute.xlu0 %167 }
  0xa0   :  { %v85_v55 = vadd.f32 %v84_v50, %v75_v49  ;;  %v114_v63 = vmul.f32 %v113_v60, %v108_v53 }
  0xa2   :  { %v95_v58 = vadd.f32 %v94_v54, %v85_v55 }
  0xa4   :  { %v105_v62 = vadd.f32 %v104_v59, %v95_v58  ;;  %v128_v0 = vpop.permute.xlu1 %127  ;;  %v192_v30 = vpop.permute.xlu0 %191 }
  0xa5   :  { %v134_v5 = vmul.f32 %v133_v3, %v128_v0 }
  0xa6   :  { %v115_v2 = vadd.f32 %v114_v63, %v105_v62 }
  0xa8   :  { %v125_v4 = vadd.f32 %v124_v1, %v115_v2 }
  0xa9   :  { %v145_v6 = vpop.permute.xlu1 %144 }
  0xaa   :  { %v135_v7 = vadd.f32 %v134_v5, %v125_v4 }
  0xac   :  { %266 = vtanh.f32 %v135_v7 }
  0xae   :  { %v151_v8 = vpop.permute.xlu1 %150 }
  0xb3   :  { %v160_v9 = vpop.permute.xlu1 %159 }
  0xb6   :  { %v267_v11 = vpop.eup %266 }
  0xb7   :  { %v147_v12 = vmul.f32 %v267_v11, %v145_v6  ;;  %v154_v13 = vrot.slane %v267_v11, 1  ;;  %v162_v14 = vrot.slane %v267_v11, 2  ;;  %v170_v18 = vrot.slane %v267_v11, 3 }
  0xb8   :  { %v176_v15 = vpop.permute.xlu1 %175  ;;  %v178_v22 = vrot.slane %v267_v11, 4  ;;  %v194_v28 = vrot.slane %v267_v11, 6  ;;  %v186_v29 = vrot.slane %v267_v11, 5  ;;  %v202_v36 = vrot.slane %v267_v11, 7 }
  0xb9   :  { %v156_v16 = vmul.f32 %v154_v13, %v151_v8  ;;  %v148_v17 = vadd.f32 %v147_v12, %v141_v10  ;;  %v164_v21 = vmul.f32 %v162_v14, %v160_v9  ;;  %v172_v24 = vmul.f32 %v170_v18, %v168_v19 }
  0xba   :  { %v180_v27 = vmul.f32 %v178_v22, %v176_v15  ;;  %v196_v34 = vmul.f32 %v194_v28, %v192_v30 }
  0xbb   :  { %v157_v20 = vadd.f32 %v156_v16, %v148_v17 }
  0xbd   :  { %v165_v23 = vadd.f32 %v164_v21, %v157_v20  ;;  %v184_v25 = vpop.permute.xlu1 %183 }
  0xbe   :  { %v188_v32 = vmul.f32 %v186_v29, %v184_v25 }
  0xbf   :  { %v173_v26 = vadd.f32 %v172_v24, %v165_v23 }
  0xc1   :  { %v181_v31 = vadd.f32 %v180_v27, %v173_v26 }
  0xc2   :  { %v200_v33 = vpop.permute.xlu1 %199 }
  0xc3   :  { %v189_v35 = vadd.f32 %v188_v32, %v181_v31  ;;  %v204_v38 = vmul.f32 %v202_v36, %v200_v33 }
  0xc5   :  { %v197_v37 = vadd.f32 %v196_v34, %v189_v35 }
  0xc7   :  { %v205_v39 = vadd.f32 %v204_v38, %v197_v37  ;;  %v211_v40 = vpop.permute.xlu1 %210 }
  0xc9   :  { %268 = vtanh.f32 %v205_v39 }
  0xd3   :  { %v269_v41 = vpop.eup %268 }
  0xd4   :  { %v213_v42 = vmul.f32 %v269_v41, %v211_v40 }
  0xd6   :  { %v214_v43 = vadd.f32 0.5, %v213_v42 }
  0xd8   :  { %215 = vst [vmem:[#allocation2] sm:$0x1] %v214_v43 }
  0xd9   :  { %281 = shalt.err (!%p278_p4)
}
  0xda   :  { %s282_s23 = scalar_lea.hbm %s348_s2, 16 }
  0xdb   :  { %p283_p5 = scmp.ne.s32.totalorder %s348_s2, %s282_s23  ;;  %p286_p6 = scmp.lt.u32.totalorder %s282_s23, %s348_s2 }
  0xdd   :  { %p288_p7 = pnand %p286_p6, %p283_p5 }
  0xdf   :  { %291 = shalt.err (!%p288_p7)
}
  0xe0   :  { %225 = dma.vmem_to_hbm [thread:$0]  %s223_s1, 16, %s348_s2, [#allocation3]  }
  0xe1   :  { %292 = dma.done.wait [#allocation3], 16  }
  0xe2   :  { %293 = vsyncadd [#allocation3], 4294967280 }
  0xe3   :  { %229 = vsyncpa [#allocation3], 1 }

</bundles_post_ra>
